<compile_context>
chip_gen: v7x
topology: tpu7x:2x2x1
jax: 0.10.0
libtpu: 0.0.40
codegen_flags: <defaults>
</compile_context>

<pallas_src>
import functools

import jax
import jax.numpy as jnp
from jax.experimental import pallas as pl
from jax.experimental.pallas import tpu as pltpu


def _contrastive_loss_kernel(o1_ref, o2_ref, tgt_ref, out_ref, acc_ref, *,
                             margin, eps, batch, block_b, steps_per_core,
                             tgt_resident):
    # o1_ref, o2_ref: (TB, D) native dtype in VMEM
    # tgt_ref:        (TB, 1) or resident (padded_rows, 1) float32 in VMEM
    # out_ref:        (1, 128) f32 partial-sum block for this core partition
    # acc_ref:        (TB, 1)  f32 VMEM scratch (per-row running sums)
    c = pl.program_id(0)            # batch partition ("parallel" -> TC on v7x)
    j = pl.program_id(1)            # reduction steps within the partition
    nj = pl.num_programs(1)
    step = c * steps_per_core + j   # global tile index (unclamped)

    @pl.when(j == 0)
    def _init():
        acc_ref[...] = jnp.zeros_like(acc_ref)

    # Subtract in the native dtype (bf16 sub runs at packed rate on v6e/v7x),
    # single upcast of `diff` to f32.  For f32 inputs this is identical to the
    # reference math.
    diff = (o2_ref[...] - o1_ref[...]).astype(jnp.float32)        # (TB, D)  VPU
    distances = jnp.sum(diff * diff, axis=1, keepdims=True)       # (TB, 1)  XLU lane-reduce

    if tgt_resident:
        start = pl.multiple_of(step * block_b, block_b)
        t = tgt_ref[pl.ds(start, block_b), :]                     # slice of resident target
    else:
        t = tgt_ref[...]                                          # per-tile block

    hinge = jnp.maximum(margin - jnp.sqrt(distances + eps), 0.0)  # F.relu(margin - sqrt(d+eps))
    losses = 0.5 * (t * distances + (1.0 - t) * hinge * hinge)    # (TB, 1)

    # Per-row accumulation (pure VPU add).  Only tiles that overhang the true
    # batch (last partial tile / clamped duplicate tiles of an uneven 2-core
    # split) pay for the iota + select mask.
    is_edge = (step + 1) * block_b > batch

    @pl.when(jnp.logical_not(is_edge))
    def _acc_full():
        acc_ref[...] += losses

    @pl.when(is_edge)
    def _acc_edge():
        row_ids = step * block_b + jax.lax.broadcasted_iota(
            jnp.int32, losses.shape, 0)
        # Keep this a select (not a multiply-by-0): padded rows may hold NaN.
        acc_ref[...] += jnp.where(row_ids < batch, losses, 0.0)

    @pl.when(j == nj - 1)
    def _finalize():
        total = jnp.sum(acc_ref[...])                 # single deferred reduce
        out_ref[...] = jnp.broadcast_to(total, out_ref.shape)


def _round_up(x, m):
    return ((x + m - 1) // m) * m


def contrastive_loss(output1, output2, target, margin, size_average=True,
                     block_rows=None, resident_target=None):
    """Pallas wrapper matching ContrastiveLoss(margin).forward(...)."""
    B, D = output1.shape
    tgt = target.reshape(B, 1).astype(jnp.float32)

    itemsize = jnp.dtype(output1.dtype).itemsize
    # Sublane multiple depends on packing (8 for f32, 16 for bf16, 32 for int8).
    row_mult = max(8, 32 // itemsize)

    if block_rows is None:
        # ~2 MiB per embedding input tile (>=1 MiB for D>=32 f32, ~85% of HBM
        # roofline), capped at 8192 rows so the (rows,1) target/acc tiles
        # (padded to 128 lanes -> ~rows*512 B each) stay cheap.  Worst case:
        # 2 inputs x 2 bufs x 2 MiB + 4 MiB acc + 8 MiB target ~= 20 MiB,
        # comfortably inside v7x's 64 MiB VMEM (and v5e/v6e's 128 MiB).
        rows_for_bytes = (2 * 1024 * 1024) // max(1, D * itemsize)
        rows_for_bytes = max(row_mult, (rows_for_bytes // row_mult) * row_mult)
        TB = min(_round_up(B, row_mult), rows_for_bytes, 8192)
    else:
        TB = _round_up(block_rows, row_mult)
    TB = max(TB, row_mult)

    total_steps = pl.cdiv(B, TB)
    # Split the batch over 2 partitions; on v7x the "parallel" leading axis is
    # sharded across the two TensorCores, on v5e/v6e it is just an outer loop.
    NC = 2 if total_steps >= 2 else 1
    spc = pl.cdiv(total_steps, NC)          # grid steps per core partition
    last_block = total_steps - 1

    def emb_index_map(c, j):
        # Clamp so duplicate tail steps of an uneven split re-read the last
        # valid block; their rows are masked out in the kernel.
        return (jnp.minimum(c * spc + j, last_block), 0)

    padded_rows = NC * spc * TB
    if resident_target is None:
        # A (N, 1) f32 array occupies ~N*512 bytes in VMEM (lane padding); keep
        # it resident only while that stays small.
        resident_target = padded_rows * 512 <= 4 * 1024 * 1024
    if resident_target:
        tgt = jnp.pad(tgt, ((0, padded_rows - B), (0, 0)))
        tgt_spec = pl.BlockSpec((padded_rows, 1), lambda c, j: (0, 0))
    else:
        tgt_spec = pl.BlockSpec((TB, 1), emb_index_map)

    kernel = functools.partial(
        _contrastive_loss_kernel,
        margin=float(margin),
        eps=1e-9,
        batch=B,
        block_b=TB,
        steps_per_core=spc,
        tgt_resident=resident_target,
    )

    cost = pl.CostEstimate(
        flops=4 * B * D + 12 * B,
        transcendentals=B,                       # one sqrt per row
        bytes_accessed=2 * B * D * itemsize + 4 * B + 4 * 128 * NC,
    )

    partials = pl.pallas_call(
        kernel,
        out_shape=jax.ShapeDtypeStruct((1, 128 * NC), jnp.float32),
        grid=(NC, spc),
        in_specs=[
            pl.BlockSpec((TB, D), emb_index_map),
            pl.BlockSpec((TB, D), emb_index_map),
            tgt_spec,
        ],
        out_specs=pl.BlockSpec((1, 128), lambda c, j: (0, c)),
        scratch_shapes=[pltpu.VMEM((TB, 1), jnp.float32)],
        compiler_params=pltpu.CompilerParams(
            dimension_semantics=("parallel", "arbitrary"),
            vmem_limit_bytes=40 * 1024 * 1024,   # <= v7x's 64 MiB physical VMEM
        ),
        cost_estimate=cost,
    )(output1, output2, tgt)

    total = jnp.sum(partials[0, ::128])          # one partial per core partition
    return total / B if size_average else total


def contrastive_loss_ref(output1, output2, target, margin, size_average=True):
    """Pure-JAX reference mirroring the PyTorch forward (f32 compute)."""
    eps = 1e-9
    o1 = output1.astype(jnp.float32)
    o2 = output2.astype(jnp.float32)
    distances = jnp.sum((o2 - o1) ** 2, axis=1)
    t = target.astype(jnp.float32)
    hinge = jnp.maximum(margin - jnp.sqrt(distances + eps), 0.0)
    losses = 0.5 * (t * distances + (1.0 - t) * hinge ** 2)
    return jnp.mean(losses) if size_average else jnp.sum(losses)


if __name__ == "__main__":
    margin = 1.0
    key = jax.random.PRNGKey(0)
    k1, k2, k3 = jax.random.split(key, 3)

    # Case 1: small f32 siamese embeddings (B, D) + 0/1 labels, mean reduction.
    B, D = 8, 32
    output1 = jax.random.normal(k1, (B, D), jnp.float32)
    output2 = jax.random.normal(k2, (B, D), jnp.float32)
    target = jax.random.bernoulli(k3, 0.5, (B,)).astype(jnp.int32)

    loss = contrastive_loss(output1, output2, target, margin)
    jax.block_until_ready(loss)
    ref = contrastive_loss_ref(output1, output2, target, margin)
    assert jnp.allclose(loss, ref, rtol=1e-5, atol=1e-6), (loss, ref)

    # Case 2: size_average=False (sum) path.
    loss_sum = contrastive_loss(output1, output2, target, margin,
                                size_average=False)
    jax.block_until_ready(loss_sum)
    ref_sum = contrastive_loss_ref(output1, output2, target, margin,
                                   size_average=False)
    assert jnp.allclose(loss_sum, ref_sum, rtol=1e-5, atol=1e-6), (loss_sum, ref_sum)

    # Case 3: bf16 inputs (native-dtype DMA + native-dtype subtraction, like
    # PyTorch on bf16).  The f32 reference upcasts before subtracting, so use a
    # loose tolerance.
    B2 = 10
    o1b = jax.random.normal(k1, (B2, D), jnp.bfloat16)
    o2b = jax.random.normal(k2, (B2, D), jnp.bfloat16)
    tgtb = jax.random.bernoulli(k3, 0.5, (B2,)).astype(jnp.int32)
    loss_b = contrastive_loss(o1b, o2b, tgtb, margin)
    jax.block_until_ready(loss_b)
    ref_b = contrastive_loss_ref(o1b, o2b, tgtb, margin)
    assert jnp.allclose(loss_b, ref_b, rtol=2e-2, atol=2e-2), (loss_b, ref_b)

    # Case 4: multi-tile grid with the 2-way core split, clamped duplicate tail
    # tile, padded-row masking and the resident-target path (small block_rows
    # forces several grid steps at a small shape).
    B3 = 40
    o1m = jax.random.normal(k1, (B3, D), jnp.float32)
    o2m = jax.random.normal(k2, (B3, D), jnp.float32)
    tgtm = jax.random.bernoulli(k3, 0.5, (B3,)).astype(jnp.int32)
    loss_m = contrastive_loss(o1m, o2m, tgtm, margin, block_rows=16)
    jax.block_until_ready(loss_m)
    ref_m = contrastive_loss_ref(o1m, o2m, tgtm, margin)
    assert jnp.allclose(loss_m, ref_m, rtol=1e-5, atol=1e-6), (loss_m, ref_m)

    # Case 5: same shapes, forcing the per-tile (non-resident) target DMA path.
    loss_n = contrastive_loss(o1m, o2m, tgtm, margin, block_rows=16,
                              resident_target=False)
    jax.block_until_ready(loss_n)
    assert jnp.allclose(loss_n, ref_m, rtol=1e-5, atol=1e-6), (loss_n, ref_m)

    print("KERNEL_OK")
</pallas_src>

<mosaic_0001>
module attributes {stable_mosaic.version = 11 : i64} {
  func.func @_contrastive_loss_kernel(%arg0: i32, %arg1: i32, %arg2: memref<8x32xf32, #tpu.memory_space<vmem>>, %arg3: memref<8x32xf32, #tpu.memory_space<vmem>>, %arg4: memref<8x1xf32, #tpu.memory_space<vmem>>, %arg5: memref<1x128xf32, #tpu.memory_space<vmem>>, %arg6: memref<8x1xf32, #tpu.memory_space<vmem>>) attributes {dimension_semantics = [#tpu.dimension_semantics<parallel>, #tpu.dimension_semantics<arbitrary>], iteration_bounds = array<i64: 1, 1>, scalar_prefetch = 0 : i64, scratch_operands = 1 : i64, tpu.core_type = #tpu.core_type<tc>, window_params = [{transform_indices = @transform_0, window_bounds = array<i64: 8, 32>}, {transform_indices = @transform_1, window_bounds = array<i64: 8, 32>}, {pipeline_mode = #tpu.pipeline_mode<synchronous>, transform_indices = @transform_2, window_bounds = array<i64: 8, 1>}, {transform_indices = @transform_3, window_bounds = array<i64: 1, 128>}]} {
    %c1_i32 = arith.constant 1 : i32
    %0 = arith.muli %arg0, %c1_i32 : i32
    %1 = arith.addi %0, %arg1 : i32
    %c0_i32 = arith.constant 0 : i32
    %2 = arith.cmpi eq, %arg1, %c0_i32 : i32
    %3 = arith.extui %2 : i1 to i32
    %c0_i32_0 = arith.constant 0 : i32
    %4 = arith.cmpi ne, %3, %c0_i32_0 : i32
    scf.if %4 {
      %cst_17 = arith.constant 0.000000e+00 : f32
      %41 = vector.broadcast %cst_17 : f32 to vector<8x1xf32>
      %c0_18 = arith.constant 0 : index
      %c0_19 = arith.constant 0 : index
      %42 = vector.load %arg6[%c0_18, %c0_19] : memref<8x1xf32, #tpu.memory_space<vmem>>, vector<8x1xf32>
      tpu.vector_store %arg6[%c0_18, %c0_19], %41 {strides = array<i32>} : memref<8x1xf32, #tpu.memory_space<vmem>>, vector<8x1xf32>,
    } else {
    }
    %c0 = arith.constant 0 : index
    %c0_1 = arith.constant 0 : index
    %5 = vector.load %arg3[%c0, %c0_1] : memref<8x32xf32, #tpu.memory_space<vmem>>, vector<8x32xf32>
    %c0_2 = arith.constant 0 : index
    %c0_3 = arith.constant 0 : index
    %6 = vector.load %arg2[%c0_2, %c0_3] : memref<8x32xf32, #tpu.memory_space<vmem>>, vector<8x32xf32>
    %7 = arith.subf %5, %6 : vector<8x32xf32>
    %8 = arith.mulf %7, %7 : vector<8x32xf32>
    %cst = arith.constant dense<0.000000e+00> : vector<8xf32>
    %9 = vector.multi_reduction <add>, %8, %cst [1] : vector<8x32xf32> to vector<8xf32>
    %10 = vector.shape_cast %9 : vector<8xf32> to vector<8x1xf32>
    %c8_i32 = arith.constant 8 : i32
    %11 = arith.muli %1, %c8_i32 : i32
    %12 = tpu.assume_multiple %11, 8 : i32
    %13 = arith.index_cast %12 : i32 to index
    %c0_4 = arith.constant 0 : index
    %14 = vector.load %arg4[%13, %c0_4] : memref<8x1xf32, #tpu.memory_space<vmem>>, vector<8x1xf32>
    %cst_5 = arith.constant 9.99999971E-10 : f32
    %15 = vector.broadcast %cst_5 : f32 to vector<8x1xf32>
    %16 = arith.addf %10, %15 : vector<8x1xf32>
    %17 = math.sqrt %16 : vector<8x1xf32>
    %cst_6 = arith.constant 1.000000e+00 : f32
    %18 = vector.broadcast %cst_6 : f32 to vector<8x1xf32>
    %19 = arith.subf %18, %17 : vector<8x1xf32>
    %cst_7 = arith.constant 0.000000e+00 : f32
    %20 = vector.broadcast %cst_7 : f32 to vector<8x1xf32>
    %21 = arith.maximumf %19, %20 : vector<8x1xf32>
    %22 = arith.mulf %14, %10 : vector<8x1xf32>
    %cst_8 = arith.constant 1.000000e+00 : f32
    %23 = vector.broadcast %cst_8 : f32 to vector<8x1xf32>
    %24 = arith.subf %23, %14 : vector<8x1xf32>
    %25 = arith.mulf %24, %21 : vector<8x1xf32>
    %26 = arith.mulf %25, %21 : vector<8x1xf32>
    %27 = arith.addf %22, %26 : vector<8x1xf32>
    %cst_9 = arith.constant 5.000000e-01 : f32
    %28 = vector.broadcast %cst_9 : f32 to vector<8x1xf32>
    %29 = arith.mulf %28, %27 : vector<8x1xf32>
    %c1_i32_10 = arith.constant 1 : i32
    %30 = arith.addi %1, %c1_i32_10 : i32
    %c8_i32_11 = arith.constant 8 : i32
    %31 = arith.muli %30, %c8_i32_11 : i32
    %c8_i32_12 = arith.constant 8 : i32
    %32 = arith.cmpi sgt, %31, %c8_i32_12 : i32
    %true = arith.constant true
    %33 = arith.xori %32, %true : i1
    %34 = arith.extui %33 : i1 to i32
    %c0_i32_13 = arith.constant 0 : i32
    %35 = arith.cmpi ne, %34, %c0_i32_13 : i32
    scf.if %35 {
      %c0_17 = arith.constant 0 : index
      %c0_18 = arith.constant 0 : index
      %41 = vector.load %arg6[%c0_17, %c0_18] : memref<8x1xf32, #tpu.memory_space<vmem>>, vector<8x1xf32>
      %42 = arith.addf %41, %29 : vector<8x1xf32>
      %c0_19 = arith.constant 0 : index
      %c0_20 = arith.constant 0 : index
      %43 = vector.load %arg6[%c0_19, %c0_20] : memref<8x1xf32, #tpu.memory_space<vmem>>, vector<8x1xf32>
      tpu.vector_store %arg6[%c0_19, %c0_20], %42 {strides = array<i32>} : memref<8x1xf32, #tpu.memory_space<vmem>>, vector<8x1xf32>,
    } else {
    }
    %36 = arith.extui %32 : i1 to i32
    %c0_i32_14 = arith.constant 0 : i32
    %37 = arith.cmpi ne, %36, %c0_i32_14 : i32
    scf.if %37 {
      %c8_i32_17 = arith.constant 8 : i32
      %41 = arith.muli %1, %c8_i32_17 : i32
      %42 = tpu.iota {dimensions = array<i32: 0>} : vector<8x1xi32>
      %43 = vector.broadcast %41 : i32 to vector<8x1xi32>
      %44 = arith.addi %43, %42 : vector<8x1xi32>
      %c0_18 = arith.constant 0 : index
      %c0_19 = arith.constant 0 : index
      %45 = vector.load %arg6[%c0_18, %c0_19] : memref<8x1xf32, #tpu.memory_space<vmem>>, vector<8x1xf32>
      %c8_i32_20 = arith.constant 8 : i32
      %46 = vector.broadcast %c8_i32_20 : i32 to vector<8x1xi32>
      %47 = arith.cmpi slt, %44, %46 : vector<8x1xi32>
      %cst_21 = arith.constant 0.000000e+00 : f32
      %48 = vector.broadcast %cst_21 : f32 to vector<8x1xf32>
      %49 = arith.select %47, %29, %48 : vector<8x1xi1>, vector<8x1xf32>
      %50 = arith.addf %45, %49 : vector<8x1xf32>
      %c0_22 = arith.constant 0 : index
      %c0_23 = arith.constant 0 : index
      %51 = vector.load %arg6[%c0_22, %c0_23] : memref<8x1xf32, #tpu.memory_space<vmem>>, vector<8x1xf32>
      tpu.vector_store %arg6[%c0_22, %c0_23], %50 {strides = array<i32>} : memref<8x1xf32, #tpu.memory_space<vmem>>, vector<8x1xf32>,
    } else {
    }
    %c0_i32_15 = arith.constant 0 : i32
    %38 = arith.cmpi eq, %arg1, %c0_i32_15 : i32
    %39 = arith.extui %38 : i1 to i32
    %c0_i32_16 = arith.constant 0 : i32
    %40 = arith.cmpi ne, %39, %c0_i32_16 : i32
    scf.if %40 {
      %c0_17 = arith.constant 0 : index
      %c0_18 = arith.constant 0 : index
      %41 = vector.load %arg6[%c0_17, %c0_18] : memref<8x1xf32, #tpu.memory_space<vmem>>, vector<8x1xf32>
      %42 = vector.shape_cast %41 : vector<8x1xf32> to vector<1x8x1xf32>
      %cst_19 = arith.constant dense<0.000000e+00> : vector<1xf32>
      %43 = vector.multi_reduction <add>, %42, %cst_19 [1, 2] : vector<1x8x1xf32> to vector<1xf32>
      %44 = vector.shape_cast %43 : vector<1xf32> to vector<1x1x1xf32>
      %45 = vector.extract %44[0, 0, 0] : f32 from vector<1x1x1xf32>
      %46 = vector.broadcast %45 : f32 to vector<1x128xf32>
      %c0_20 = arith.constant 0 : index
      %c0_21 = arith.constant 0 : index
      %47 = vector.load %arg5[%c0_20, %c0_21] : memref<1x128xf32, #tpu.memory_space<vmem>>, vector<1x128xf32>
      tpu.vector_store %arg5[%c0_20, %c0_21], %46 {strides = array<i32>} : memref<1x128xf32, #tpu.memory_space<vmem>>, vector<1x128xf32>,
    } else {
    }
    return
  }
  func.func @transform_0(%arg0: i32, %arg1: i32) -> (i32, i32) {
    %c1_i32 = arith.constant 1 : i32
    %0 = arith.muli %arg0, %c1_i32 : i32
    %1 = arith.addi %0, %arg1 : i32
    %c0_i32 = arith.constant 0 : i32
    %2 = arith.minsi %1, %c0_i32 : i32
    %c0_i32_0 = arith.constant 0 : i32
    %c0_i32_1 = arith.constant 0 : i32
    return %2, %c0_i32_0 : i32, i32
  }
  func.func @transform_1(%arg0: i32, %arg1: i32) -> (i32, i32) {
    %c1_i32 = arith.constant 1 : i32
    %0 = arith.muli %arg0, %c1_i32 : i32
    %1 = arith.addi %0, %arg1 : i32
    %c0_i32 = arith.constant 0 : i32
    %2 = arith.minsi %1, %c0_i32 : i32
    %c0_i32_0 = arith.constant 0 : i32
    %c0_i32_1 = arith.constant 0 : i32
    return %2, %c0_i32_0 : i32, i32
  }
  func.func @transform_2(%arg0: i32, %arg1: i32) -> (i32, i32) {
    %c0_i32 = arith.constant 0 : i32
    %c0_i32_0 = arith.constant 0 : i32
    %c0_i32_1 = arith.constant 0 : i32
    return %c0_i32, %c0_i32_0 : i32, i32
  }
  func.func @transform_3(%arg0: i32, %arg1: i32) -> (i32, i32) {
    %c0_i32 = arith.constant 0 : i32
    %c0_i32_0 = arith.constant 0 : i32
    return %c0_i32, %arg0 : i32, i32
  }
}

</mosaic_0001>

<bundles_post_ra>
// kernel: tpu_custom_call.1
= control target key start
LH: loop header
LB: loop body
LE: loop exit
PB: predicated region body
PF: predicated region fallthrough
CT: control target
= control target key end

     0   :  { %8 = vsyncpa [#allocation4], 0  ;;  %s271_s0 = inlined_call_operand.vmem [shape: f32[8,32], index: 0, kind: input, shape index: {}]   ;;  %s272_s1 = inlined_call_operand.hbm [shape: f32[8,32], index: 1, kind: input, shape index: {}]   ;;  %s273_s2 = inlined_call_operand.vmem [shape: f32[8,1], index: 2, kind: input, shape index: {}]   ;;  %s274_s3 = inlined_call_operand.hbm [shape: f32[1,128], index: 3, kind: output, shape index: {}]  }
   0x1   :  { %9 = vsyncpa [#allocation5], 0  ;;  %s215_s12 = smov [#allocation3]   ;;  %s167_s16 = scalar_lea.hbm %s272_s1, 128 }
   0x2   :  { %s33_s13 = sshll.u32 %s215_s12, 4  ;;  %p168_p0 = scmp.ne.s32.totalorder %s272_s1, %s167_s16  ;;  %s34_s13 = int_to_ptr.vmem [resolvable:$true] %s33_s13 }
   0x3   :  { %p171_p1 = scmp.lt.u32.totalorder %s167_s16, %s272_s1 }
   0x5   :  { %p173_p2 = pnand %p171_p1, %p168_p0 }
   0x7   :  { %176 = shalt.err (!%p173_p2)
}
   0x8   :  { %s177_s21 = scalar_lea.vmem %s34_s13, 128  ;;  %p182_p4 = scmp.lt.s32.totalorder %s34_s13, %s34_s13 }
   0x9   :  { %p178_p3 = scmp.ne.s32.totalorder %s34_s13, %s177_s21  ;;  %p183_p5 = scmp.lt.s32.totalorder %s177_s21, %s177_s21 }
   0xb   :  { %p184_p6 = por %p183_p5, %p182_p4 }
   0xd   :  { %p185_p7 = pnand %p184_p6, %p178_p3 }
   0xf   :  { %188 = shalt.err (!%p185_p7)
}
  0x10   :  { %36 = dma.hbm_to_vmem [thread:$0]  %s272_s1, 128, %s34_s13, [#allocation4]  }
  0x11   :  { %211 = dma.done.wait [#allocation4], 128  }
  0x12   :  { %212 = vsyncadd [#allocation4], 4294967168  ;;  %v69_v0 = vld [vmem:[#allocation3] sm:$0xff]  ;;  %v70_v1 = vld [vmem:[%s271_s0] sm:$0xff]  ;;  %vm73_vm0 = vcmask 261120   ;;  %vm67_vm1 = vcmask 7168  }
  0x13   :  { %v71_v2 = vsub.f32 %v69_v0, %v70_v1  ;;  %v216_v5 = vmov 0.0   ;;  %v79_v12 = vld [vmem:[%s273_s2] sm:$0xff]  ;;  %s217_s2 = smov [#allocation6]  }
  0x14   :  { %68 = vst.msk [vmem:[#allocation2] sm:$0xff] %vm67_vm1, %v216_v5  ;;  %v91_v14 = vsub.f32 1.0, %v79_v12  ;;  %s143_s26 = sshll.u32 %s217_s2, 4  ;;  %s144_s26 = int_to_ptr.vmem [resolvable:$true] %s143_s26 }
  0x15   :  { %v72_v3 = vmul.f32 %v71_v2, %v71_v2  ;;  %s189_s28 = scalar_lea.vmem %s144_s26, 16  ;;  %s193_s29 = scalar_lea.vmem %s144_s26, 32 }
  0x16   :  { %p190_p8 = scmp.ne.s32.totalorder %s144_s26, %s189_s28  ;;  %p194_p9 = scmp.lt.s32.totalorder %s144_s26, %s144_s26 }
  0x17   :  { %v74_v4 = vsel %vm73_vm0, %v72_v3, 0.0  ;;  %p195_p10 = scmp.lt.s32.totalorder %s193_s29, %s189_s28 }
  0x18   :  { %75 = vadd.xlane.f32.xlu0 %v74_v4 }
  0x19   :  { %p196_p11 = por %p195_p10, %p194_p9 }
  0x1b   :  { %v103_v21 = vld [vmem:[#allocation2] sm:$0xff]  ;;  %p197_p12 = pnand %p196_p11, %p190_p8 }
  0xa5   :  { %v76_v6 = vpop.xlane.xlu0 %75 }
  0xa6   :  { %v80_v7 = vadd.f32 1e-09, %v76_v6  ;;  %v90_v18 = vmul.f32 %v79_v12, %v76_v6 }
  0xa8   :  { %165 = vrsqrt.f32 %v80_v7  ;;  %vm83_vm2 = vcmp.eq.f32.partialorder %v80_v7, inf  ;;  %v86_v10 = vand.u32 2147483648, %v80_v7  ;;  %vm85_vm3 = vcmp.eq.f32.partialorder %v80_v7, 0.0 }
  0xb2   :  { %v166_v8 = vpop.eup %165 }
  0xb3   :  { %v82_v9 = vmul.f32 %v166_v8, %v80_v7 }
  0xb5   :  { %v84_v11 = vsel %vm83_vm2, %v80_v7, %v82_v9 }
  0xb6   :  { %v87_v13 = vsel %vm85_vm3, %v86_v10, %v84_v11 }
  0xb7   :  { %v88_v15 = vsub.f32 1.0, %v87_v13 }
  0xb9   :  { %v89_v16 = vmax.f32 %v88_v15, 0.0 }
  0xbb   :  { %v92_v17 = vmul.f32 %v91_v14, %v89_v16 }
  0xbd   :  { %v93_v19 = vmul.f32 %v92_v17, %v89_v16 }
  0xbf   :  { %v94_v20 = vadd.f32 %v93_v19, %v90_v18 }
  0xc1   :  { %v95_v22 = vmul.f32 0.5, %v94_v20 }
  0xc3   :  { %v104_v23 = vadd.f32 %v103_v21, %v95_v22 }
  0xc5   :  { %106 = vst.msk [vmem:[#allocation2] sm:$0xff] %vm67_vm1, %v104_v23 }
  0xcc   :  { %v123_v24 = vld [vmem:[#allocation2] sm:$0xff] }
  0xcd   :  { %v125_v25 = vsel %vm67_vm1, %v123_v24, 0.0 }
  0xce   :  { %126 = vadd.xlane.f32.xlu0 %v125_v25 }
 0x15b   :  { %v127_v26 = vpop.xlane.xlu0 %126 }
 0x15c   :  { %v128_v27 = vrot.slane %v127_v26, 4 }
 0x15e   :  { %v129_v28 = vadd.f32 %v128_v27, %v127_v26 }
 0x160   :  { %v130_v29 = vrot.slane %v129_v28, 2 }
 0x162   :  { %v131_v30 = vadd.f32 %v130_v29, %v129_v28 }
 0x164   :  { %v132_v31 = vrot.slane %v131_v30, 1 }
 0x166   :  { %v133_v32 = vadd.f32 %v132_v31, %v131_v30 }
 0x168   :  { %160 = vpush %v133_v32 }
 0x199   :  { %s161_s27 = spop %160 }
 0x19a   :  { %v135_v33 = vstv %s161_s27 }
 0x19b   :  { %136 = vst [vmem:[#allocation6] sm:$0x1] %v135_v33 }
 0x19c   :  { %200 = shalt.err (!%p197_p12)
}
 0x19d   :  { %s201_s5 = scalar_lea.hbm %s274_s3, 16 }
 0x19e   :  { %p202_p13 = scmp.ne.s32.totalorder %s274_s3, %s201_s5  ;;  %p205_p0 = scmp.lt.u32.totalorder %s201_s5, %s274_s3 }
 0x1a0   :  { %p207_p1 = pnand %p205_p0, %p202_p13 }
 0x1a2   :  { %210 = shalt.err (!%p207_p1)
}
 0x1a3   :  { %146 = dma.vmem_to_hbm [thread:$0]  %s144_s26, 16, %s274_s3, [#allocation5]  }
 0x1a4   :  { %213 = dma.done.wait [#allocation5], 16  }
 0x1a5   :  { %214 = vsyncadd [#allocation5], 4294967280 }
 0x1a6   :  { %150 = vsyncpa [#allocation4], 1 }
 0x1a7   :  { %151 = vsyncpa [#allocation5], 1 }

</bundles_post_ra>
